<compile_context>
chip_gen: v6e
topology: v6e:2x2x1
jax: 0.10.0
libtpu: 0.0.40
codegen_flags: <defaults>
</compile_context>

<pallas_src>
import functools

import jax
import jax.numpy as jnp
import numpy as np
from jax.experimental import pallas as pl
from jax.experimental.pallas import tpu as pltpu


_VMEM_LIMIT_BYTES = 40 * 1024 * 1024      # leaves headroom on v7x's 64 MiB/TC
_RESIDENT_K_BUDGET = 16 * 1024 * 1024     # keep zn VMEM-resident below this


def _round_up(x, m):
    return (x + m - 1) // m * m


# ---------------------------------------------------------------------------
# Kernel 1: prep (O(N*D)) — fused concat + L2-normalize + 1/T fold + positives.
# Row-tiled, "parallel" 1-D grid.
# ---------------------------------------------------------------------------
def _nt_xent_prep_kernel(zi_ref, zj_ref, zn_ref, pos_ref, *, inv_temp):
    zi = zi_ref[...].astype(jnp.float32)
    zj = zj_ref[...].astype(jnp.float32)
    tp = zi.shape[0]                       # pairs in this tile (static)

    # 1 / max(||row||, 1e-8): rsqrt runs on the EUP; multiply replaces divide.
    inv_ni = jax.lax.rsqrt(
        jnp.maximum(jnp.sum(zi * zi, axis=-1, keepdims=True), 1e-16))
    inv_nj = jax.lax.rsqrt(
        jnp.maximum(jnp.sum(zj * zj, axis=-1, keepdims=True), 1e-16))
    zin = zi * inv_ni
    zjn = zj * inv_nj

    # Positive logit of pair p: cos(z_i[p], z_j[p]) / T (each pair's positive
    # appears twice in the loss, once per row of the pair).
    pos_ref[...] = jnp.sum(zin * zjn, axis=-1, keepdims=True) * jnp.float32(inv_temp)

    # Fold 1/T into the matmul operands: (s*zn)(s*zn)^T == zn zn^T / T.
    # NOTE: zn rows come out pair-tile interleaved ([i rows of tile r; j rows
    # of tile r]) instead of [all i; all j].  Harmless: the loss only needs the
    # *set* of rows (lse summed over all rows; self term removed analytically).
    scale = jnp.float32(inv_temp ** 0.5)
    zn_ref[0:tp, :] = (zin * scale).astype(zn_ref.dtype)
    zn_ref[tp:2 * tp, :] = (zjn * scale).astype(zn_ref.dtype)


# ---------------------------------------------------------------------------
# Kernel 2a (main path): zn whole-array resident in VMEM, 1-D "parallel" grid
# over row tiles, fat-chunk column loop inside the kernel.  Fixed shift
# M0 = 1/T (logits are bounded by 1/T since |cos| <= 1); self term and zero pad
# columns removed analytically — no per-element masking anywhere.
# ---------------------------------------------------------------------------
def _nt_xent_lse_resident_kernel(q_ref, k_ref, lse_ref, *,
                                 inv_temp, chunk_rows, n_pad_cols):
    m0 = jnp.float32(inv_temp)
    num_chunks = k_ref.shape[0] // chunk_rows       # static

    q = q_ref[...]                                   # (t_m, dp), bf16

    def body(c, s):
        start = pl.multiple_of(c * chunk_rows, chunk_rows)
        kc = k_ref[pl.ds(start, chunk_rows), :]      # (t_n, dp) from resident zn
        sim = jax.lax.dot_general(                   # (t_m, t_n), f32 MXU acc
            q, kc, dimension_numbers=(((1,), (1,)), ((), ())),
            preferred_element_type=jnp.float32)
        return s + jnp.sum(jnp.exp(sim - m0), axis=-1, keepdims=True)

    s = jax.lax.fori_loop(
        0, num_chunks, body, jnp.zeros((q.shape[0], 1), jnp.float32))

    # Analytic removal of (a) the self-similarity (the diagonal PyTorch masks;
    # equals sum_d q_d^2 of the bf16 operands) and (b) the zero pad columns
    # (each contributes exactly exp(0 - M0), same EUP exp as the loop).
    qf = q.astype(jnp.float32)
    self_sim = jnp.sum(qf * qf, axis=-1, keepdims=True)
    s = s - jnp.exp(self_sim - m0)
    if n_pad_cols:
        s = s - jnp.float32(n_pad_cols) * jnp.exp(jnp.zeros_like(self_sim) - m0)
    # TODO(synk): for extremely small temperatures (T < ~0.02) with adversarial
    # inputs the analytic self-removal could cancel; fall back to explicit
    # masking of the diagonal chunk in that regime.
    lse_ref[...] = m0 + jnp.log(jnp.maximum(s, jnp.float32(1e-30)))


# ---------------------------------------------------------------------------
# Kernel 2b (fallback for huge N*D): streamed columns, asymmetric 2-D grid
# (rows "parallel", fat column tiles "arbitrary"), single f32 scratch sum.
# ---------------------------------------------------------------------------
def _nt_xent_lse_stream_kernel(q_ref, k_ref, lse_ref, s_ref, *,
                               inv_temp, n_pad_cols):
    j = pl.program_id(1)
    m0 = jnp.float32(inv_temp)

    @pl.when(j == 0)
    def _init():
        s_ref[...] = jnp.zeros_like(s_ref)

    sim = jax.lax.dot_general(
        q_ref[...], k_ref[...], dimension_numbers=(((1,), (1,)), ((), ())),
        preferred_element_type=jnp.float32)
    s_ref[...] += jnp.sum(jnp.exp(sim - m0), axis=-1, keepdims=True)

    @pl.when(j == pl.num_programs(1) - 1)
    def _finalize():
        qf = q_ref[...].astype(jnp.float32)
        self_sim = jnp.sum(qf * qf, axis=-1, keepdims=True)
        s = s_ref[...] - jnp.exp(self_sim - m0)
        if n_pad_cols:
            s = s - jnp.float32(n_pad_cols) * jnp.exp(jnp.zeros_like(self_sim) - m0)
        lse_ref[...] = m0 + jnp.log(jnp.maximum(s, jnp.float32(1e-30)))


# ---------------------------------------------------------------------------
# Wrapper
# ---------------------------------------------------------------------------
def _choose_tiles(n, dp, itemsize, row_mult):
    """Return (t_m, t_n, n_padded); t_n is a multiple of t_m dividing n_padded."""
    t_m = 256
    while t_m > row_mult and n < 2 * t_m:       # keep >= 2 row tiles (v7x 2 TCs)
        t_m //= 2
    t_m = max(t_m, row_mult)
    n_p = _round_up(n, t_m)
    r_tiles = n_p // t_m
    # Fat column chunks, capped by a VMEM byte budget for the (t_n, dp) block.
    max_tn = max(t_m, min(2048, (8 * 1024 * 1024) // max(1, dp * itemsize)))
    c_mult = 1
    for m in range(min(r_tiles, max_tn // t_m), 0, -1):
        if r_tiles % m == 0:
            c_mult = m
            break
    return t_m, c_mult * t_m, n_p


def _pick_prep_tile(bw, row_mult):
    for t in (64, 32, 16, 8):
        if t <= bw and t % row_mult == 0 and bw % t == 0:
            return t
    return bw    # whole-array fallback; prep is only O(N*D)


def nt_xent_loss(z_i, z_j, temperature, world_size=1, *, tiles=None,
                 matmul_dtype=jnp.bfloat16, force_stream=False):
    """SimCLR NT-Xent loss.  z_i, z_j: (batch_size * world_size, D) -> scalar."""
    del world_size                      # rows of z_i/z_j already span B * world
    bw, d = z_i.shape
    n = 2 * bw
    inv_temp = 1.0 / float(temperature)
    itemsize = jnp.dtype(matmul_dtype).itemsize
    row_mult = max(8, 8 * (4 // itemsize))        # sublane packing (16 for bf16)

    # Lane-align the feature (contraction) axis; zero columns change nothing.
    dp = max(128, _round_up(d, 128))
    if dp != d:
        z_i = jnp.pad(z_i, ((0, 0), (0, dp - d)))
        z_j = jnp.pad(z_j, ((0, 0), (0, dp - d)))

    # ---- prep: concat + normalize + 1/T fold + positives, row-tiled ---------
    t_p = _pick_prep_tile(bw, row_mult)
    zn, pos = pl.pallas_call(
        functools.partial(_nt_xent_prep_kernel, inv_temp=inv_temp),
        out_shape=(
            jax.ShapeDtypeStruct((n, dp), matmul_dtype),   # scaled normalized rows
            jax.ShapeDtypeStruct((bw, 1), jnp.float32),    # positive logit / pair
        ),
        grid_spec=pltpu.PrefetchScalarGridSpec(
            num_scalar_prefetch=0,
            grid=(bw // t_p,),
            in_specs=[pl.BlockSpec((t_p, dp), lambda r: (r, 0)),
                      pl.BlockSpec((t_p, dp), lambda r: (r, 0))],
            out_specs=(pl.BlockSpec((2 * t_p, dp), lambda r: (r, 0)),
                       pl.BlockSpec((t_p, 1), lambda r: (r, 0))),
        ),
        compiler_params=pltpu.CompilerParams(
            dimension_semantics=("parallel",),
            vmem_limit_bytes=_VMEM_LIMIT_BYTES),
    )(z_i, z_j)

    # ---- tile selection + row padding (never a full-extent fallback) --------
    if tiles is not None:
        t_m, t_n = tiles
        assert t_m % row_mult == 0 and t_n % t_m == 0
        n_p = _round_up(n, t_n)
    else:
        t_m, t_n, n_p = _choose_tiles(n, dp, itemsize, row_mult)
    n_pad = n_p - n
    if n_pad:
        # Zero pad rows: their exact contribution (exp(-1/T) per real row) is
        # removed in-kernel; their own lse rows are dropped below.
        zn = jnp.pad(zn, ((0, n_pad), (0, 0)))

    grid_rows = n_p // t_m
    zn_bytes = n_p * dp * itemsize
    flops = 2 * n_p * n_p * dp
    use_resident = (not force_stream) and zn_bytes <= _RESIDENT_K_BUDGET

    if use_resident:
        lse = pl.pallas_call(
            functools.partial(_nt_xent_lse_resident_kernel, inv_temp=inv_temp,
                              chunk_rows=t_n, n_pad_cols=n_pad),
            out_shape=jax.ShapeDtypeStruct((n_p, 1), jnp.float32),
            grid_spec=pltpu.PrefetchScalarGridSpec(
                num_scalar_prefetch=0,
                grid=(grid_rows,),
                in_specs=[pl.BlockSpec((t_m, dp), lambda i: (i, 0)),
                          pl.BlockSpec(memory_space=pltpu.MemorySpace.VMEM)],
                out_specs=pl.BlockSpec((t_m, 1), lambda i: (i, 0)),
            ),
            compiler_params=pltpu.CompilerParams(
                dimension_semantics=("parallel",),
                vmem_limit_bytes=_VMEM_LIMIT_BYTES),
            cost_estimate=pl.CostEstimate(
                flops=flops, transcendentals=n_p * n_p,
                bytes_accessed=2 * zn_bytes + n_p * 4),
        )(zn, zn)
    else:
        lse = pl.pallas_call(
            functools.partial(_nt_xent_lse_stream_kernel, inv_temp=inv_temp,
                              n_pad_cols=n_pad),
            out_shape=jax.ShapeDtypeStruct((n_p, 1), jnp.float32),
            grid_spec=pltpu.PrefetchScalarGridSpec(
                num_scalar_prefetch=0,
                grid=(grid_rows, n_p // t_n),
                in_specs=[pl.BlockSpec((t_m, dp), lambda i, j: (i, 0)),
                          pl.BlockSpec((t_n, dp), lambda i, j: (j, 0))],
                out_specs=pl.BlockSpec((t_m, 1), lambda i, j: (i, 0)),
                scratch_shapes=[pltpu.VMEM((t_m, 1), jnp.float32)],
            ),
            compiler_params=pltpu.CompilerParams(
                dimension_semantics=("parallel", "arbitrary"),
                vmem_limit_bytes=_VMEM_LIMIT_BYTES),
            cost_estimate=pl.CostEstimate(
                flops=flops, transcendentals=n_p * n_p,
                bytes_accessed=(grid_rows + 1) * zn_bytes + n_p * 4),
        )(zn, zn)

    # loss = CrossEntropyLoss(reduction='sum')([pos, negatives], 0) / N
    #      = (sum_rows lse_row - sum_rows pos_row) / N ; positives count twice.
    return (jnp.sum(lse[:n, 0]) - 2.0 * jnp.sum(pos)) / n


def nt_xent_reference(z_i, z_j, temperature, world_size=1):
    """Pure-JAX f32 reference mirroring the PyTorch forward, for verification."""
    bw = z_i.shape[0]
    z = jnp.concatenate([z_i, z_j], axis=0).astype(jnp.float32)
    n = z.shape[0]
    zn = z / jnp.maximum(jnp.linalg.norm(z, axis=-1, keepdims=True), 1e-8)
    sim = jnp.dot(zn, zn.T, precision=jax.lax.Precision.HIGHEST) / temperature
    idx = jnp.arange(n)
    pos = sim[idx, (idx + bw) % n]
    sim_masked = jnp.where(jnp.eye(n, dtype=bool), -jnp.inf, sim)
    lse = jax.scipy.special.logsumexp(sim_masked, axis=-1)
    return jnp.sum(lse - pos) / n


if __name__ == "__main__":
    batch_size = 80          # bw=80 -> prep tiles of 16; n=160 pads to 192 below
    dim = 48                 # not a multiple of 128 -> exercises feature padding
    temperature = 0.5

    key = jax.random.PRNGKey(0)
    k1, k2 = jax.random.split(key)
    z_i = jax.random.normal(k1, (batch_size, dim), dtype=jnp.float32)
    z_j = jax.random.normal(k2, (batch_size, dim), dtype=jnp.float32)

    ref = jax.block_until_ready(nt_xent_reference(z_i, z_j, temperature))

    # Main (VMEM-resident zn) path: 6 "parallel" row tiles, 3-chunk in-kernel
    # column loop, 32 zero pad rows removed analytically.
    loss_res = jax.block_until_ready(
        jax.jit(functools.partial(nt_xent_loss, temperature=temperature,
                                  tiles=(32, 64)))(z_i, z_j))
    np.testing.assert_allclose(np.asarray(loss_res), np.asarray(ref),
                               rtol=2e-2, atol=2e-2)

    # Streaming (asymmetric 2-D grid) fallback path.
    loss_str = jax.block_until_ready(
        jax.jit(functools.partial(nt_xent_loss, temperature=temperature,
                                  tiles=(32, 64), force_stream=True))(z_i, z_j))
    np.testing.assert_allclose(np.asarray(loss_str), np.asarray(ref),
                               rtol=2e-2, atol=2e-2)

    # Default auto-tiling smoke test.
    loss_auto = jax.block_until_ready(
        jax.jit(functools.partial(nt_xent_loss, temperature=temperature))(z_i, z_j))
    np.testing.assert_allclose(np.asarray(loss_auto), np.asarray(ref),
                               rtol=2e-2, atol=2e-2)

    print("KERNEL_OK")
</pallas_src>

<mosaic_0001>
module attributes {stable_mosaic.version = 11 : i64} {
  func.func @_nt_xent_prep_kernel(%arg0: i32, %arg1: memref<16x128xf32, #tpu.memory_space<vmem>>, %arg2: memref<16x128xf32, #tpu.memory_space<vmem>>, %arg3: memref<32x128xbf16, #tpu.memory_space<vmem>>, %arg4: memref<16x1xf32, #tpu.memory_space<vmem>>) attributes {dimension_semantics = [#tpu.dimension_semantics<parallel>], iteration_bounds = array<i64: 5>, scalar_prefetch = 0 : i64, scratch_operands = 0 : i64, tpu.core_type = #tpu.core_type<tc>, window_params = [{transform_indices = @transform_0, window_bounds = array<i64: 16, 128>}, {transform_indices = @transform_1, window_bounds = array<i64: 16, 128>}, {transform_indices = @transform_2, window_bounds = array<i64: 32, 128>}, {transform_indices = @transform_3, window_bounds = array<i64: 16, 1>}]} {
    %c0 = arith.constant 0 : index
    %c0_0 = arith.constant 0 : index
    %0 = vector.load %arg1[%c0, %c0_0] : memref<16x128xf32, #tpu.memory_space<vmem>>, vector<16x128xf32>
    %c0_1 = arith.constant 0 : index
    %c0_2 = arith.constant 0 : index
    %1 = vector.load %arg2[%c0_1, %c0_2] : memref<16x128xf32, #tpu.memory_space<vmem>>, vector<16x128xf32>
    %2 = arith.mulf %0, %0 : vector<16x128xf32>
    %cst = arith.constant dense<0.000000e+00> : vector<16xf32>
    %3 = vector.multi_reduction <add>, %2, %cst [1] : vector<16x128xf32> to vector<16xf32>
    %4 = vector.shape_cast %3 : vector<16xf32> to vector<16x1xf32>
    %cst_3 = arith.constant 1.000000e-16 : f32
    %5 = vector.broadcast %cst_3 : f32 to vector<16x1xf32>
    %6 = arith.maximumf %4, %5 : vector<16x1xf32>
    %7 = math.rsqrt %6 : vector<16x1xf32>
    %8 = arith.mulf %1, %1 : vector<16x128xf32>
    %cst_4 = arith.constant dense<0.000000e+00> : vector<16xf32>
    %9 = vector.multi_reduction <add>, %8, %cst_4 [1] : vector<16x128xf32> to vector<16xf32>
    %10 = vector.shape_cast %9 : vector<16xf32> to vector<16x1xf32>
    %cst_5 = arith.constant 1.000000e-16 : f32
    %11 = vector.broadcast %cst_5 : f32 to vector<16x1xf32>
    %12 = arith.maximumf %10, %11 : vector<16x1xf32>
    %13 = math.rsqrt %12 : vector<16x1xf32>
    %14 = vector.broadcast %7 : vector<16x1xf32> to vector<16x128xf32>
    %15 = arith.mulf %0, %14 : vector<16x128xf32>
    %16 = vector.broadcast %13 : vector<16x1xf32> to vector<16x128xf32>
    %17 = arith.mulf %1, %16 : vector<16x128xf32>
    %18 = arith.mulf %15, %17 : vector<16x128xf32>
    %cst_6 = arith.constant dense<0.000000e+00> : vector<16xf32>
    %19 = vector.multi_reduction <add>, %18, %cst_6 [1] : vector<16x128xf32> to vector<16xf32>
    %20 = vector.shape_cast %19 : vector<16xf32> to vector<16x1xf32>
    %cst_7 = arith.constant 2.000000e+00 : f32
    %21 = vector.broadcast %cst_7 : f32 to vector<16x1xf32>
    %22 = arith.mulf %20, %21 : vector<16x1xf32>
    %c0_8 = arith.constant 0 : index
    %c0_9 = arith.constant 0 : index
    %23 = vector.load %arg4[%c0_8, %c0_9] : memref<16x1xf32, #tpu.memory_space<vmem>>, vector<16x1xf32>
    tpu.vector_store %arg4[%c0_8, %c0_9], %22 {strides = array<i32>} : memref<16x1xf32, #tpu.memory_space<vmem>>, vector<16x1xf32>,
    %cst_10 = arith.constant 1.41421354 : f32
    %24 = vector.broadcast %cst_10 : f32 to vector<16x128xf32>
    %25 = arith.mulf %15, %24 : vector<16x128xf32>
    %26 = arith.truncf %25 : vector<16x128xf32> to vector<16x128xbf16>
    %c0_11 = arith.constant 0 : index
    %c0_12 = arith.constant 0 : index
    %27 = vector.load %arg3[%c0_11, %c0_12] : memref<32x128xbf16, #tpu.memory_space<vmem>>, vector<16x128xbf16>
    tpu.vector_store %arg3[%c0_11, %c0_12], %26 {strides = array<i32>} : memref<32x128xbf16, #tpu.memory_space<vmem>>, vector<16x128xbf16>,
    %cst_13 = arith.constant 1.41421354 : f32
    %28 = vector.broadcast %cst_13 : f32 to vector<16x128xf32>
    %29 = arith.mulf %17, %28 : vector<16x128xf32>
    %30 = arith.truncf %29 : vector<16x128xf32> to vector<16x128xbf16>
    %c16 = arith.constant 16 : index
    %c0_14 = arith.constant 0 : index
    %31 = vector.load %arg3[%c16, %c0_14] : memref<32x128xbf16, #tpu.memory_space<vmem>>, vector<16x128xbf16>
    tpu.vector_store %arg3[%c16, %c0_14], %30 {strides = array<i32>} : memref<32x128xbf16, #tpu.memory_space<vmem>>, vector<16x128xbf16>,
    return
  }
  func.func @transform_0(%arg0: i32) -> (i32, i32) {
    %c0_i32 = arith.constant 0 : i32
    %c0_i32_0 = arith.constant 0 : i32
    return %arg0, %c0_i32 : i32, i32
  }
  func.func @transform_1(%arg0: i32) -> (i32, i32) {
    %c0_i32 = arith.constant 0 : i32
    %c0_i32_0 = arith.constant 0 : i32
    return %arg0, %c0_i32 : i32, i32
  }
  func.func @transform_2(%arg0: i32) -> (i32, i32) {
    %c0_i32 = arith.constant 0 : i32
    %c0_i32_0 = arith.constant 0 : i32
    return %arg0, %c0_i32 : i32, i32
  }
  func.func @transform_3(%arg0: i32) -> (i32, i32) {
    %c0_i32 = arith.constant 0 : i32
    %c0_i32_0 = arith.constant 0 : i32
    return %arg0, %c0_i32 : i32, i32
  }
}

module attributes {stable_mosaic.version = 11 : i64} {
  func.func @_nt_xent_lse_resident_kernel(%arg0: i32, %arg1: memref<32x128xbf16, #tpu.memory_space<vmem>>, %arg2: memref<192x128xbf16, #tpu.memory_space<vmem>>, %arg3: memref<32x1xf32, #tpu.memory_space<vmem>>) attributes {dimension_semantics = [#tpu.dimension_semantics<parallel>], iteration_bounds = array<i64: 6>, scalar_prefetch = 0 : i64, scratch_operands = 0 : i64, tpu.core_type = #tpu.core_type<tc>, window_params = [{transform_indices = @transform_0, window_bounds = array<i64: 32, 128>}, {pipeline_mode = #tpu.pipeline_mode<synchronous>, transform_indices = @transform_1, window_bounds = array<i64: 192, 128>}, {transform_indices = @transform_2, window_bounds = array<i64: 32, 1>}]} {
    %c0 = arith.constant 0 : index
    %c0_0 = arith.constant 0 : index
    %0 = vector.load %arg1[%c0, %c0_0] : memref<32x128xbf16, #tpu.memory_space<vmem>>, vector<32x128xbf16>
    %cst = arith.constant 0.000000e+00 : f32
    %1 = vector.broadcast %cst : f32 to vector<32x1xf32>
    %cst_1 = arith.constant 2.000000e+00 : f32
    %c0_i32 = arith.constant 0 : i32
    %c3_i32 = arith.constant 3 : i32
    %2 = arith.addi %c0_i32, %c3_i32 : i32
    %c1_i32 = arith.constant 1 : i32
    %3 = scf.for %arg4 = %c0_i32 to %2 step %c1_i32 iter_args(%arg5 = %1) -> (vector<32x1xf32>)  : i32 {
      %c64_i32 = arith.constant 64 : i32
      %25 = arith.muli %arg4, %c64_i32 : i32
      %26 = tpu.assume_multiple %25, 64 : i32
      %27 = arith.index_cast %26 : i32 to index
      %c0_12 = arith.constant 0 : index
      %28 = vector.load %arg2[%27, %c0_12] : memref<192x128xbf16, #tpu.memory_space<vmem>>, vector<64x128xbf16>
      %cst_13 = arith.constant dense<0.000000e+00> : vector<32x64xf32>
      %29 = tpu.matmul %0, %28, %cst_13 {dimension_numbers = #tpu.dot_dimension_numbers<[1], [1], [0], [0], [0, 0, 1, 0], [], []>} : vector<32x128xbf16>, vector<64x128xbf16>, vector<32x64xf32> -> vector<32x64xf32>
      %30 = vector.broadcast %cst_1 : f32 to vector<32x64xf32>
      %31 = arith.subf %29, %30 : vector<32x64xf32>
      %32 = math.exp %31 : vector<32x64xf32>
      %cst_14 = arith.constant dense<0.000000e+00> : vector<32xf32>
      %33 = vector.multi_reduction <add>, %32, %cst_14 [1] : vector<32x64xf32> to vector<32xf32>
      %34 = vector.shape_cast %33 : vector<32xf32> to vector<32x1xf32>
      %35 = arith.addf %arg5, %34 : vector<32x1xf32>
      scf.yield %35 : vector<32x1xf32>
    }
    %c3_i32_2 = arith.constant 3 : i32
    %4 = arith.extf %0 : vector<32x128xbf16> to vector<32x128xf32>
    %5 = arith.mulf %4, %4 : vector<32x128xf32>
    %cst_3 = arith.constant dense<0.000000e+00> : vector<32xf32>
    %6 = vector.multi_reduction <add>, %5, %cst_3 [1] : vector<32x128xf32> to vector<32xf32>
    %7 = vector.shape_cast %6 : vector<32xf32> to vector<32x1xf32>
    %cst_4 = arith.constant 2.000000e+00 : f32
    %8 = vector.broadcast %cst_4 : f32 to vector<32x1xf32>
    %9 = arith.subf %7, %8 : vector<32x1xf32>
    %10 = math.exp %9 : vector<32x1xf32>
    %11 = arith.subf %3, %10 : vector<32x1xf32>
    %cst_5 = arith.constant 0.000000e+00 : f32
    %12 = vector.broadcast %cst_5 : f32 to vector<32x1xf32>
    %cst_6 = arith.constant 2.000000e+00 : f32
    %13 = vector.broadcast %cst_6 : f32 to vector<32x1xf32>
    %14 = arith.subf %12, %13 : vector<32x1xf32>
    %15 = math.exp %14 : vector<32x1xf32>
    %cst_7 = arith.constant 3.200000e+01 : f32
    %16 = vector.broadcast %cst_7 : f32 to vector<32x1xf32>
    %17 = arith.mulf %16, %15 : vector<32x1xf32>
    %18 = arith.subf %11, %17 : vector<32x1xf32>
    %cst_8 = arith.constant 1.000000e-30 : f32
    %19 = vector.broadcast %cst_8 : f32 to vector<32x1xf32>
    %20 = arith.maximumf %18, %19 : vector<32x1xf32>
    %21 = math.log %20 : vector<32x1xf32>
    %cst_9 = arith.constant 2.000000e+00 : f32
    %22 = vector.broadcast %cst_9 : f32 to vector<32x1xf32>
    %23 = arith.addf %22, %21 : vector<32x1xf32>
    %c0_10 = arith.constant 0 : index
    %c0_11 = arith.constant 0 : index
    %24 = vector.load %arg3[%c0_10, %c0_11] : memref<32x1xf32, #tpu.memory_space<vmem>>, vector<32x1xf32>
    tpu.vector_store %arg3[%c0_10, %c0_11], %23 {strides = array<i32>} : memref<32x1xf32, #tpu.memory_space<vmem>>, vector<32x1xf32>,
    return
  }
  func.func @transform_0(%arg0: i32) -> (i32, i32) {
    %c0_i32 = arith.constant 0 : i32
    %c0_i32_0 = arith.constant 0 : i32
    return %arg0, %c0_i32 : i32, i32
  }
  func.func @transform_1(%arg0: i32) -> (i32, i32) {
    %c0_i32 = arith.constant 0 : i32
    %c0_i32_0 = arith.constant 0 : i32
    %c0_i32_1 = arith.constant 0 : i32
    return %c0_i32, %c0_i32_0 : i32, i32
  }
  func.func @transform_2(%arg0: i32) -> (i32, i32) {
    %c0_i32 = arith.constant 0 : i32
    %c0_i32_0 = arith.constant 0 : i32
    return %arg0, %c0_i32 : i32, i32
  }
}

</mosaic_0001>

<bundles_post_ra>
// kernel: nt_xent_loss.2
= control target key start
LH: loop header
LB: loop body
LE: loop exit
PB: predicated region body
PF: predicated region fallthrough
CT: control target
= control target key end

     0   :  { %s453_s12 = smov 0   ;;  %s485_s0 = inlined_call_operand.vmem [shape: f32[80,128], index: 0, kind: input, shape index: {}]   ;;  %s486_s1 = inlined_call_operand.vmem [shape: f32[80,128], index: 1, kind: input, shape index: {}]   ;;  %s487_s2 = inlined_call_operand.vmem [shape: bf16[160,128], index: 2, kind: output, shape index: {0}]   ;;  %s488_s3 = inlined_call_operand.vmem [shape: f32[80,1], index: 3, kind: output, shape index: {1}]  }
   0x1 LB: > { %s375_s13 = sadd.s32 4294967295, %s431_s12   ;;  %p379_p0 = scmp.ge.s32.totalorder %s431_s12, 1  ;;  %s431_s12 = sphi %s453_s12, %s14_s12  }
   0x2   : > { %p152_p1 = scmp.lt.s32.totalorder %s431_s12, 6 }
   0x4   : > { %p153_p2 = pnand %p379_p0, %p152_p1 }
   0x5   : > { %s380_s14 = sshll.u32 (!%p153_p2), %s375_s13, 1  ;;  %s384_s22 = sshll.u32 (!%p153_p2), %s375_s13, 2 }
   0x6   : > { %156 = sbr.rel (%p153_p2) target bundleno = 321 (0x141), region = 28  ;;  %p187_p3 = scmp.lt.s32.totalorder (!%p153_p2), %s380_s14, 9 }
   0x7   : > { %p199_p4 = scmp.lt.s32.totalorder (!%p153_p2), %s384_s22, 19 }
   0xb   : > { %s490_s14 = smov (!%p187_p3, %s380_s14), 9  ;;  %s492_s22 = smov (!%p199_p4, %s384_s22), 19  ;;  %vm246_vm0 = vcmask 7168  }
   0xc   : > { %s463_s15 = sshll.u32 %s490_s14, 3  ;;  %s385_s23 = sshll.u32 %s492_s22, 2 }
   0xd   : > { %s196_s18 = scalar_lea.vmem %s486_s1, %s463_s15  ;;  %s190_s21 = scalar_lea.vmem %s485_s0, %s463_s15 }
   0xe   : > { %v212_v0 = vld [vmem:[%s196_s18] sm:$0xff]  ;;  %v213_v2 = vld [vmem:[%s196_s18 + $0x8] sm:$0xff]  ;;  %s202_s26 = scalar_lea.vmem %s487_s2, %s385_s23  ;;  %s208_s29 = scalar_lea.vmem %s488_s3, %s463_s15 }
   0xf   : > { %v210_v1 = vld [vmem:[%s190_s21] sm:$0xff]  ;;  %v224_v3 = vmul.f32 %v212_v0, %v212_v0  ;;  %v211_v5 = vld [vmem:[%s190_s21 + $0x8] sm:$0xff]  ;;  %v225_v6 = vmul.f32 %v213_v2, %v213_v2 }
  0x10   : > { %v214_v4 = vmul.f32 %v210_v1, %v210_v1  ;;  %v215_v7 = vmul.f32 %v211_v5, %v211_v5 }
  0x11   : > { %226 = vadd.xlane.f32.xlu1 %v224_v3 }
  0x12   : > { %216 = vadd.xlane.f32.xlu0 %v214_v4 }
  0x15   : > { %228 = vadd.xlane.f32.xlu1 %v225_v6 }
  0x16   : > { %218 = vadd.xlane.f32.xlu0 %v215_v7 }
  0x9a   : > { %v227_v8 = vpop.xlane.xlu1 %226 }
  0x9b   : > { %v217_v9 = vpop.xlane.xlu0 %216  ;;  %v230_v10 = vmax.f32 %v227_v8, 1e-16 }
  0x9c   : > { %v220_v11 = vmax.f32 %v217_v9, 1e-16 }
  0x9d   : > { %417 = vrsqrt.f32 %v230_v10 }
  0x9e   : > { %419 = vrsqrt.f32 %v220_v11  ;;  %v229_v12 = vpop.xlane.xlu1 %228 }
  0x9f   : > { %v219_v13 = vpop.xlane.xlu0 %218  ;;  %v231_v14 = vmax.f32 %v229_v12, 1e-16 }
  0xa0   : > { %v221_v15 = vmax.f32 %v219_v13, 1e-16 }
  0xa1   : > { %421 = vrsqrt.f32 %v231_v14 }
  0xa2   : > { %423 = vrsqrt.f32 %v221_v15 }
  0xaa   : > { %v418_v16 = vpop.eup %417 }
  0xab   : > { %v420_v17 = vpop.eup %419  ;;  %v236_v18 = vmul.f32 %v418_v16, %v212_v0 }
  0xac   : > { %v234_v19 = vmul.f32 %v420_v17, %v210_v1 }
  0xad   : > { %v261_v25 = vmul.f32 1.4142135, %v236_v18 }
  0xae   : > { %v422_v20 = vpop.eup %421  ;;  %v238_v21 = vmul.f32 %v236_v18, %v234_v19  ;;  %v249_v27 = vmul.f32 1.4142135, %v234_v19 }
  0xaf   : > { %v424_v22 = vpop.eup %423  ;;  %v237_v23 = vmul.f32 %v422_v20, %v213_v2 }
  0xb0   : > { %240 = vadd.xlane.f32.xlu0 %v238_v21  ;;  %v235_v24 = vmul.f32 %v424_v22, %v211_v5 }
  0xb1   : > { %v262_v26 = vmul.f32 1.4142135, %v237_v23 }
  0xb2   : > { %v239_v28 = vmul.f32 %v237_v23, %v235_v24  ;;  %v250_v29 = vmul.f32 1.4142135, %v235_v24 }
  0xb3   : > { %v406_v30 = vpack.c.bf16 %v262_v26, %v261_v25 }
  0xb4   : > { %v401_v31 = vpack.c.bf16 %v250_v29, %v249_v27  ;;  %242 = vadd.xlane.f32.xlu1 %v239_v28 }
  0xb5   : > { %408 = vst [vmem:[%s202_s26 + $0x8] sm:$0xff] %v406_v30  }
  0xb6   : > { %402 = vst [vmem:[%s202_s26] sm:$0xff] %v401_v31  }
 0x139   : > { %v241_v32 = vpop.xlane.xlu0 %240 }
 0x13a   : > { %v244_v33 = vmul.f32 2.0, %v241_v32 }
 0x13c   : > { %247 = vst.msk [vmem:[%s208_s29] sm:$0xff] %vm246_vm0, %v244_v33 }
 0x13d   : > { %v243_v34 = vpop.xlane.xlu1 %242 }
 0x13e   : > { %v245_v35 = vmul.f32 2.0, %v243_v34 }
 0x140   : > { %248 = vst.msk [vmem:[%s208_s29 + $0x8] sm:$0xff] %vm246_vm0, %v245_v35 }
 0x141 PF: > { %s14_s12 = sadd.s32 1, %s431_s12  }
 0x142   : > { %p11_p5 = scmp.ge.s32.totalorder %s14_s12, 7  }
 0x144   :  { %13 = sbr.rel (!%p11_p5) target bundleno = 1 (0x1), region = 73 }

// kernel: nt_xent_loss.3
= control target key start
LH: loop header
LB: loop body
LE: loop exit
PB: predicated region body
PF: predicated region fallthrough
CT: control target
= control target key end

     0   :  { %s609_s9 = smov 0   ;;  %s680_s0 = inlined_call_operand.vmem [shape: bf16[192,128], index: 0, kind: input, shape index: {}, may-alias: {0,1}]   ;;  %s681_s1 = inlined_call_operand.vmem [shape: bf16[192,128], index: 1, kind: input, shape index: {}, may-alias: {0,1}]   ;;  %s682_s2 = inlined_call_operand.vmem [shape: f32[192,1], index: 2, kind: output, shape index: {}]  }
   0x1 LB: > { %s421_s10 = sadd.s32 4294967295, %s572_s9   ;;  %p425_p0 = scmp.ge.s32.totalorder %s572_s9, 1  ;;  %s572_s9 = sphi %s609_s9, %s12_s9  }
   0x2   : > { %p113_p1 = scmp.lt.s32.totalorder %s572_s9, 7 }
   0x4   : > { %p114_p2 = pnand %p425_p0, %p113_p1 }
   0x5   : > { %s426_s11 = sshll.u32 (!%p114_p2), %s421_s10, 2  ;;  %s641_s20 = smov (!%p114_p2), 0  }
   0x6   : > { %117 = sbr.rel (%p114_p2) target bundleno = 460 (0x1cc), region = 28  ;;  %p136_p3 = scmp.lt.s32.totalorder (!%p114_p2), %s426_s11, 23 }
   0xb   : > { %s688_s11 = smov (!%p136_p3, %s426_s11), 23  ;;  %v633_v4 = vmov 0.0   ;;  %v635_v5 = vmov 0.0   ;;  %v637_v6 = vmov 0.0   ;;  %v639_v7 = vmov 0.0  }
   0xc   : > { %s427_s12 = sshll.u32 %s688_s11, 2  ;;  %s429_s13 = sshll.u32 %s688_s11, 3 }
   0xd   : > { %s139_s16 = scalar_lea.vmem %s680_s0, %s427_s12  ;;  %s623_s19 = scalar_lea.vmem %s682_s2, %s429_s13 }
   0xe   : > { %v625_v0 = vld [vmem:[%s139_s16] sm:$0xf]  ;;  %v627_v1 = vld [vmem:[%s139_s16 + $0x4] sm:$0xf]  ;;  %v629_v2 = vld [vmem:[%s139_s16 + $0x8] sm:$0xf] }
   0xf   : > { %v631_v3 = vld [vmem:[%s139_s16 + $0xc] sm:$0xf] }
  0x10 LB: >> { %v432_v8 = vcombine.low %v625_v0, %v627_v1  ;;  %s430_s21 = sshll.u32 %s592_s20, 6  ;;  %v433_v13 = vcombine.low %v629_v2, %v631_v3  ;;  %vm272_vm0 = vcmask 523264   ;;  %s157_s20 = sadd.s32 1, %s592_s20   ;;  %s592_s20 = sphi %s641_s20, %s157_s20   ;;  %v588_v7 = vphi %v639_v7, %v686_v7   ;;  %v584_v6 = vphi %v637_v6, %v685_v6   ;;  %v580_v5 = vphi %v635_v5, %v684_v5   ;;  %v576_v4 = vphi %v633_v4, %v683_v4  }
  0x11   : >> { %s163_s22 = sshra.s32 %s430_s21, 3  ;;  %p154_p4 = scmp.ge.s32.totalorder %s157_s20, 3  }
  0x12   : >> { %466 = vmatprep.mubr.bf16.mxu0 %v432_v8  ;;  %s431_s23 = sshll.u32 %s163_s22, 2  ;;  %v291_v42 = vunpack.c.l.bf16 (%p154_p4), %v629_v2  ;;  %v289_v43 = vunpack.c.l.bf16 (%p154_p4), %v625_v0  ;;  %v292_v44 = vunpack.c.l.bf16 (%p154_p4), %v631_v3  ;;  %v290_v45 = vunpack.c.l.bf16 (%p154_p4), %v627_v1 }
  0x13   : >> { %s166_s26 = scalar_lea.vmem %s681_s1, %s431_s23  ;;  %vm341_vm1 = vcmask (%p154_p4), 7168  }
  0x14   : >> { %v518_v9 = vld [vmem:[%s166_s26 + $0x18] sm:$0xff]   ;;  %v519_v10 = vld [vmem:[%s166_s26 + $0x10] sm:$0xff]   ;;  %v520_v11 = vld [vmem:[%s166_s26 + $0x8] sm:$0xff]   ;;  %v295_v46 = vmul.f32 (%p154_p4), %v291_v42, %v291_v42  ;;  %v293_v47 = vmul.f32 (%p154_p4), %v289_v43, %v289_v43  ;;  %v296_v48 = vmul.f32 (%p154_p4), %v292_v44, %v292_v44  ;;  %v294_v49 = vmul.f32 (%p154_p4), %v290_v45, %v290_v45 }
  0x15   : >> { %458 = vmatprep.subr.bf16.mxu0 %v518_v9  ;;  %v521_v12 = vld [vmem:[%s166_s26] sm:$0xff]  }
  0x16   : >> { %459 = vmatpush3.bf16.xpose.msra.mxu0 %v518_v9 }
  0x17   : >> { %460 = vmatprep.subr.bf16.mxu0 %v519_v10 }
  0x1e   : >> { %461 = vmatpush3.bf16.xpose.msra.mxu0 %v519_v10 }
  0x1f   : >> { %462 = vmatprep.subr.bf16.mxu0 %v520_v11 }
  0x26   : >> { %463 = vmatpush3.bf16.xpose.msra.mxu0 %v520_v11 }
  0x27   : >> { %464 = vmatprep.subr.bf16.mxu0 %v521_v12 }
  0x2e   : >> { %465 = vmatpush3.bf16.xpose.msra.mxu0 %v521_v12 }
  0x35   : >> { %467 = vmatmul.mubr.bf16.vlgmr.msra.gmra.mxu0 %v433_v13 }
  0xf5   : >> { %v468_v14 = vpop.f32.mrf.mxu0 }
  0xf6   : >> { %v440_v15 = vadd.f32 -2.0, %v468_v14 }
  0xf7   : >> { %v245_v16 = vpop.f32.mrf.mxu0 }
  0xf8   : >> { %v268_v17 = vmul.f32 1.442695, %v440_v15  ;;  %v438_v18 = vadd.f32 -2.0, %v245_v16 }
  0xf9   : >> { %v469_v19 = vpop.f32.mrf.mxu0 }
  0xfa   : >> { %522 = vpow2.f32 %v268_v17  ;;  %v264_v20 = vmul.f32 1.442695, %v438_v18  ;;  %v441_v21 = vadd.f32 -2.0, %v469_v19 }
  0xfb   : >> { %v248_v22 = vpop.f32.mrf.mxu0 }
  0xfc   : >> { %524 = vpow2.f32 %v264_v20  ;;  %v270_v23 = vmul.f32 1.442695, %v441_v21  ;;  %v439_v24 = vadd.f32 -2.0, %v248_v22 }
  0xfe   : >> { %526 = vpow2.f32 %v270_v23  ;;  %v266_v25 = vmul.f32 1.442695, %v439_v24 }
 0x100   : >> { %528 = vpow2.f32 %v266_v25 }
 0x107   : >> { %v523_v26 = vpop.eup %522 }
 0x108   : >> { %v279_v27 = vsel %vm272_vm0, %v523_v26, 0.0 }
 0x109   : >> { %v525_v28 = vpop.eup %524  ;;  %280 = vadd.xlane.f32.xlu1 %v279_v27 }
 0x10a   : >> { %v273_v29 = vsel %vm272_vm0, %v525_v28, 0.0 }
 0x10b   : >> { %v527_v30 = vpop.eup %526  ;;  %274 = vadd.xlane.f32.xlu0 %v273_v29 }
 0x10c   : >> { %v282_v31 = vsel %vm272_vm0, %v527_v30, 0.0 }
 0x10d   : >> { %v529_v32 = vpop.eup %528  ;;  %283 = vadd.xlane.f32.xlu1 %v282_v31 }
 0x10e   : >> { %v276_v33 = vsel %vm272_vm0, %v529_v32, 0.0 }
 0x10f   : >> { %277 = vadd.xlane.f32.xlu0 %v276_v33 }
 0x111   : > { %301 = vadd.xlane.f32.xlu1 (%p154_p4), %v295_v46 }
 0x113   : > { %297 = vadd.xlane.f32.xlu0 (%p154_p4), %v293_v47 }
 0x115   : > { %303 = vadd.xlane.f32.xlu1 (%p154_p4), %v296_v48 }
 0x117   : > { %299 = vadd.xlane.f32.xlu0 (%p154_p4), %v294_v49 }
 0x192   : >> { %v281_v34 = vpop.xlane.xlu1 %280 }
 0x193   : >> { %v287_v35 = vadd.f32 %v580_v5, %v281_v34  }
 0x194   : >> { %v275_v36 = vpop.xlane.xlu0 %274 }
 0x195   : >> { %v285_v37 = vadd.f32 %v588_v7, %v275_v36   ;;  %v684_v5 = vmov %v287_v35 }
 0x196   : >> { %v284_v38 = vpop.xlane.xlu1 %283 }
 0x197   : >> { %v288_v39 = vadd.f32 %v576_v4, %v284_v38   ;;  %v686_v7 = vmov %v285_v37  ;;  %156 = sbr.rel (!%p154_p4) target bundleno = 16 (0x10), region = 66 }
 0x198   : >> { %v278_v40 = vpop.xlane.xlu0 %277 }
 0x199   : >> { %v286_v41 = vadd.f32 %v584_v6, %v278_v40   ;;  %v683_v4 = vmov %v288_v39 }
 0x19a   : > { %v302_v50 = vpop.xlane.xlu1 (%p154_p4), %301 }
 0x19b   : >> { %v685_v6 = vmov %v286_v41  ;;  %v444_v52 = vadd.f32 (%p154_p4), -2.0, %v302_v50 }
 0x19c   : > { %v298_v51 = vpop.xlane.xlu0 %297 }
 0x19d   : > { %v442_v53 = vadd.f32 -2.0, %v298_v51  ;;  %v313_v54 = vmul.f32 1.442695, %v444_v52 }
 0x19e   : > { %v304_v56 = vpop.xlane.xlu1 %303 }
 0x19f   : > { %v309_v55 = vmul.f32 1.442695, %v442_v53  ;;  %530 = vpow2.f32 %v313_v54  ;;  %v445_v58 = vadd.f32 -2.0, %v304_v56 }
 0x1a0   : > { %v300_v57 = vpop.xlane.xlu0 %299 }
 0x1a1   : > { %v443_v59 = vadd.f32 -2.0, %v300_v57  ;;  %532 = vpow2.f32 %v309_v55  ;;  %v315_v60 = vmul.f32 1.442695, %v445_v58 }
 0x1a3   : > { %v311_v61 = vmul.f32 1.442695, %v443_v59  ;;  %534 = vpow2.f32 %v315_v60 }
 0x1a5   : > { %536 = vpow2.f32 %v311_v61 }
 0x1ac   : > { %v531_v62 = vpop.eup %530 }
 0x1ad   : > { %v319_v0 = vsub.f32 %v287_v35, %v531_v62 }
 0x1ae   : > { %v533_v63 = vpop.eup %532 }
 0x1af   : > { %v317_v1 = vsub.f32 %v285_v37, %v533_v63  ;;  %v448_v2 = vadd.f32 -4.330729, %v319_v0 }
 0x1b0   : > { %v535_v3 = vpop.eup %534 }
 0x1b1   : > { %v446_v4 = vadd.f32 -4.330729, %v317_v1  ;;  %v327_v6 = vmax.f32 %v448_v2, 1e-30  ;;  %v320_v7 = vsub.f32 %v288_v39, %v535_v3 }
 0x1b2   : > { %v537_v5 = vpop.eup %536 }
 0x1b3   : > { %v325_v8 = vmax.f32 %v446_v4, 1e-30  ;;  %v318_v9 = vsub.f32 %v286_v41, %v537_v5  ;;  %538 = vlog2.f32 %v327_v6  ;;  %v449_v10 = vadd.f32 -4.330729, %v320_v7 }
 0x1b5   : > { %540 = vlog2.f32 %v325_v8  ;;  %v447_v11 = vadd.f32 -4.330729, %v318_v9  ;;  %v328_v12 = vmax.f32 %v449_v10, 1e-30 }
 0x1b7   : > { %v326_v13 = vmax.f32 %v447_v11, 1e-30  ;;  %542 = vlog2.f32 %v328_v12 }
 0x1b9   : > { %544 = vlog2.f32 %v326_v13 }
 0x1c0   : > { %v539_v14 = vpop.eup %538 }
 0x1c1   : > { %v334_v16 = vmul.f32 0.6931472, %v539_v14 }
 0x1c2   : > { %v541_v15 = vpop.eup %540 }
 0x1c3   : > { %v330_v17 = vmul.f32 0.6931472, %v541_v15  ;;  %v339_v18 = vadd.f32 2.0, %v334_v16 }
 0x1c4   : > { %v543_v19 = vpop.eup %542 }
 0x1c5   : > { %v337_v20 = vadd.f32 2.0, %v330_v17  ;;  %344 = vst.msk [vmem:[%s623_s19 + $0x10] sm:$0xff] %vm341_vm1, %v339_v18  ;;  %v336_v22 = vmul.f32 0.6931472, %v543_v19 }
 0x1c6   : > { %v545_v21 = vpop.eup %544 }
 0x1c7   : > { %342 = vst.msk [vmem:[%s623_s19] sm:$0xff] %vm341_vm1, %v337_v20  ;;  %v332_v23 = vmul.f32 0.6931472, %v545_v21  ;;  %v340_v24 = vadd.f32 2.0, %v336_v22 }
 0x1c9   : > { %v338_v25 = vadd.f32 2.0, %v332_v23  ;;  %345 = vst.msk [vmem:[%s623_s19 + $0x18] sm:$0xff] %vm341_vm1, %v340_v24 }
 0x1cb   : > { %343 = vst.msk [vmem:[%s623_s19 + $0x8] sm:$0xff] %vm341_vm1, %v338_v25 }
 0x1cc PF: > { %s12_s9 = sadd.s32 1, %s572_s9  }
 0x1cd   : > { %p9_p5 = scmp.ge.s32.totalorder %s12_s9, 8  }
 0x1cf   :  { %11 = sbr.rel (!%p9_p5) target bundleno = 1 (0x1), region = 77 }

</bundles_post_ra>
